<compile_context>
chip_gen: v5e
topology: v5e:2x2
jax: 0.10.0
libtpu: 0.0.40
codegen_flags: <defaults>
</compile_context>

<pallas_src>
import jax
import jax.numpy as jnp
from jax.experimental import pallas as pl
from jax.experimental.pallas import tpu as pltpu


def _softswitch_kernel(x_ref, a_ref, b_ref, k_ref, o_ref):
    # Compute in f32 (no-op for f32 inputs; required for bf16 on v5e EUP/VPU).
    x = x_ref[...].astype(jnp.float32)            # (row_tile, col_tile)
    a = a_ref[...].astype(jnp.float32)            # (1, col_tile) -> broadcast
    b = b_ref[...].astype(jnp.float32)
    k = k_ref[...].astype(jnp.float32)
    smooth_step = jax.nn.sigmoid(k * (x - a))
    o_ref[...] = (x + (b - x) * smooth_step).astype(o_ref.dtype)


def _choose_col_tile(cols, max_cols=2048):
    """Full width for moderate dims; otherwise a 128-multiple divisor."""
    if cols <= max_cols:
        return cols
    ct = (max_cols // 128) * 128
    while ct >= 128:
        if cols % ct == 0:
            return ct
        ct -= 128
    return cols  # fallback: no column tiling


def _choose_row_tile(rows, cols, itemsize, target_bytes=4 << 20):
    """~4 MiB blocks (works within scoped VMEM on v5e/v6e/v7x), rows mult of 8."""
    tr = target_bytes // max(1, cols * itemsize)
    tr = max(8, (tr // 8) * 8)
    if tr >= rows:
        return rows  # single full-height block
    return int(tr)


def softswitch(x, a, b, k, *, donate_x=False):
    """Apply SoftSwitch elementwise over the last axis of x.

    x: (..., dim)   a, b, k: (dim,)
    """
    orig_shape = x.shape
    dim = orig_shape[-1]
    dtype = x.dtype
    itemsize = jnp.dtype(dtype).itemsize

    x2 = x.reshape(-1, dim)                       # (rows, dim)
    rows = x2.shape[0]

    # Lane-fold small feature dims so output stores are lane-dense.
    fold = 1
    if dim < 128 and 128 % dim == 0 and rows % (128 // dim) == 0:
        fold = 128 // dim
    cols = dim * fold
    rows_f = rows // fold

    if fold > 1:
        x2 = x2.reshape(rows_f, cols)
        a2 = jnp.tile(a, fold).reshape(1, cols)
        b2 = jnp.tile(b, fold).reshape(1, cols)
        k2 = jnp.tile(k, fold).reshape(1, cols)
    else:
        a2 = a.reshape(1, cols)
        b2 = b.reshape(1, cols)
        k2 = k.reshape(1, cols)

    col_tile = _choose_col_tile(cols)
    row_tile = _choose_row_tile(rows_f, col_tile, itemsize)

    grid = (pl.cdiv(rows_f, row_tile), cols // col_tile)

    out = pl.pallas_call(
        _softswitch_kernel,
        out_shape=jax.ShapeDtypeStruct((rows_f, cols), dtype),
        grid_spec=pltpu.PrefetchScalarGridSpec(
            num_scalar_prefetch=0,
            grid=grid,
            in_specs=[
                pl.BlockSpec((row_tile, col_tile), lambda i, j: (i, j)),
                pl.BlockSpec((1, col_tile), lambda i, j: (0, j)),
                pl.BlockSpec((1, col_tile), lambda i, j: (0, j)),
                pl.BlockSpec((1, col_tile), lambda i, j: (0, j)),
            ],
            out_specs=pl.BlockSpec((row_tile, col_tile), lambda i, j: (i, j)),
        ),
        compiler_params=pltpu.CompilerParams(
            dimension_semantics=("parallel", "parallel"),
            vmem_limit_bytes=32 << 20,
        ),
        input_output_aliases=({0: 0} if donate_x else {}),
    )(x2, a2, b2, k2)

    return out.reshape(orig_shape)


def init_softswitch_params(dim, a_init=200.0, dtype=jnp.float32):
    """Deterministic init matching SoftSwitchInitializationHighA."""
    a = jnp.full((dim,), a_init, dtype=dtype)
    b = jnp.zeros((dim,), dtype=dtype)
    k = jnp.zeros((dim,), dtype=dtype)
    return a, b, k


def _reference(x, a, b, k):
    xf = x.astype(jnp.float32)
    smooth_step = jax.nn.sigmoid(k.astype(jnp.float32) * (xf - a.astype(jnp.float32)))
    return (xf + (b.astype(jnp.float32) - xf) * smooth_step).astype(x.dtype)


if __name__ == "__main__":
    key = jax.random.PRNGKey(0)

    # --- Test 1: module's default init (HighA) on the canonical small shape.
    batch, seq, dim = 2, 8, 32
    k1, k2, k3, k4 = jax.random.split(key, 4)
    x = jax.random.normal(k1, (batch, seq, dim), dtype=jnp.float32)
    a, b, k = init_softswitch_params(dim)
    out = jax.block_until_ready(softswitch(x, a, b, k))
    ref = _reference(x, a, b, k)
    assert out.shape == x.shape
    assert jnp.allclose(out, ref, atol=1e-6, rtol=1e-6)

    # --- Test 2: random params + a shape that skips lane-folding (rows=15).
    x_b = jax.random.normal(k2, (3, 5, dim), dtype=jnp.float32)
    a_b = jax.random.normal(k3, (dim,), dtype=jnp.float32)
    b_b = jax.random.normal(k4, (dim,), dtype=jnp.float32)
    k_b = jnp.full((dim,), 2.0, dtype=jnp.float32)
    out_b = jax.block_until_ready(softswitch(x_b, a_b, b_b, k_b))
    ref_b = _reference(x_b, a_b, b_b, k_b)
    assert out_b.shape == x_b.shape
    assert jnp.allclose(out_b, ref_b, atol=1e-5, rtol=1e-5)

    print("KERNEL_OK")
</pallas_src>

<mosaic_0001>
module attributes {stable_mosaic.version = 11 : i64} {
  func.func @_softswitch_kernel(%arg0: i32, %arg1: i32, %arg2: memref<4x128xf32, #tpu.memory_space<vmem>>, %arg3: memref<1x128xf32, #tpu.memory_space<vmem>>, %arg4: memref<1x128xf32, #tpu.memory_space<vmem>>, %arg5: memref<1x128xf32, #tpu.memory_space<vmem>>, %arg6: memref<4x128xf32, #tpu.memory_space<vmem>>) attributes {dimension_semantics = [#tpu.dimension_semantics<parallel>, #tpu.dimension_semantics<parallel>], iteration_bounds = array<i64: 1, 1>, scalar_prefetch = 0 : i64, scratch_operands = 0 : i64, tpu.core_type = #tpu.core_type<tc>, window_params = [{transform_indices = @transform_0, window_bounds = array<i64: 4, 128>}, {transform_indices = @transform_1, window_bounds = array<i64: 1, 128>}, {transform_indices = @transform_2, window_bounds = array<i64: 1, 128>}, {transform_indices = @transform_3, window_bounds = array<i64: 1, 128>}, {transform_indices = @transform_4, window_bounds = array<i64: 4, 128>}]} {
    %c0 = arith.constant 0 : index
    %c0_0 = arith.constant 0 : index
    %0 = vector.load %arg2[%c0, %c0_0] : memref<4x128xf32, #tpu.memory_space<vmem>>, vector<4x128xf32>
    %c0_1 = arith.constant 0 : index
    %c0_2 = arith.constant 0 : index
    %1 = vector.load %arg3[%c0_1, %c0_2] : memref<1x128xf32, #tpu.memory_space<vmem>>, vector<1x128xf32>
    %c0_3 = arith.constant 0 : index
    %c0_4 = arith.constant 0 : index
    %2 = vector.load %arg4[%c0_3, %c0_4] : memref<1x128xf32, #tpu.memory_space<vmem>>, vector<1x128xf32>
    %c0_5 = arith.constant 0 : index
    %c0_6 = arith.constant 0 : index
    %3 = vector.load %arg5[%c0_5, %c0_6] : memref<1x128xf32, #tpu.memory_space<vmem>>, vector<1x128xf32>
    %4 = vector.broadcast %1 : vector<1x128xf32> to vector<4x128xf32>
    %5 = arith.subf %0, %4 : vector<4x128xf32>
    %6 = vector.broadcast %3 : vector<1x128xf32> to vector<4x128xf32>
    %7 = arith.mulf %6, %5 : vector<4x128xf32>
    %8 = arith.negf %7 : vector<4x128xf32>
    %9 = math.exp %8 : vector<4x128xf32>
    %cst = arith.constant 1.000000e+00 : f32
    %10 = vector.broadcast %cst : f32 to vector<4x128xf32>
    %11 = arith.addf %10, %9 : vector<4x128xf32>
    %12 = arith.divf %10, %11 : vector<4x128xf32>
    %13 = vector.broadcast %2 : vector<1x128xf32> to vector<4x128xf32>
    %14 = arith.subf %13, %0 : vector<4x128xf32>
    %15 = arith.mulf %14, %12 : vector<4x128xf32>
    %16 = arith.addf %0, %15 : vector<4x128xf32>
    %c0_7 = arith.constant 0 : index
    %c0_8 = arith.constant 0 : index
    %17 = vector.load %arg6[%c0_7, %c0_8] : memref<4x128xf32, #tpu.memory_space<vmem>>, vector<4x128xf32>
    tpu.vector_store %arg6[%c0_7, %c0_8], %16 {strides = array<i32>} : memref<4x128xf32, #tpu.memory_space<vmem>>, vector<4x128xf32>,
    return
  }
  func.func @transform_0(%arg0: i32, %arg1: i32) -> (i32, i32) {
    %c0_i32 = arith.constant 0 : i32
    return %arg0, %arg1 : i32, i32
  }
  func.func @transform_1(%arg0: i32, %arg1: i32) -> (i32, i32) {
    %c0_i32 = arith.constant 0 : i32
    %c0_i32_0 = arith.constant 0 : i32
    return %c0_i32, %arg1 : i32, i32
  }
  func.func @transform_2(%arg0: i32, %arg1: i32) -> (i32, i32) {
    %c0_i32 = arith.constant 0 : i32
    %c0_i32_0 = arith.constant 0 : i32
    return %c0_i32, %arg1 : i32, i32
  }
  func.func @transform_3(%arg0: i32, %arg1: i32) -> (i32, i32) {
    %c0_i32 = arith.constant 0 : i32
    %c0_i32_0 = arith.constant 0 : i32
    return %c0_i32, %arg1 : i32, i32
  }
  func.func @transform_4(%arg0: i32, %arg1: i32) -> (i32, i32) {
    %c0_i32 = arith.constant 0 : i32
    return %arg0, %arg1 : i32, i32
  }
}

</mosaic_0001>

<bundles_post_ra>
// kernel: tpu_custom_call.1
= control target key start
LH: loop header
LB: loop body
LE: loop exit
PB: predicated region body
PF: predicated region fallthrough
CT: control target
= control target key end

     0   :  { %9 = vsyncpa [#allocation3], 0  ;;  %s234_s0 = inlined_call_operand.hbm [shape: f32[4,128], index: 0, kind: input, shape index: {}]   ;;  %s235_s1 = inlined_call_operand.hbm [shape: f32[1,128], index: 1, kind: input, shape index: {}]   ;;  %s236_s2 = inlined_call_operand.vmem [shape: f32[1,128], index: 2, kind: input, shape index: {}]   ;;  %s237_s3 = inlined_call_operand.vmem [shape: f32[1,128], index: 3, kind: input, shape index: {}]   ;;  %s238_s4 = inlined_call_operand.hbm [shape: f32[4,128], index: 4, kind: output, shape index: {}]  }
   0x1   :  { %10 = vsyncpa [#allocation6], 0 }
   0x2   :  { %11 = vsyncpa [#allocation4], 0  ;;  %s17_s17 = sshll.u32 %s234_s0, 4  ;;  %s191_s18 = smov [#allocation2]   ;;  %s18_s17 = int_to_ptr.hbm [resolvable:$true] %s17_s17 }
   0x3   :  { %s19_s19 = sshll.u32 %s191_s18, 4  ;;  %s28_s22 = sshll.u32 %s235_s1, 4  ;;  %s20_s19 = int_to_ptr.vmem [resolvable:$true] %s19_s19  ;;  %s29_s22 = int_to_ptr.hbm [resolvable:$true] %s28_s22 }
   0x4   :  { %22 = dma.hbm_to_vmem [thread:$0]  %s18_s17, 64, %s20_s19, [#allocation3]  }
   0x5   :  { %s192_s23 = smov [#allocation5]  }
   0x6   :  { %s30_s24 = sshll.u32 %s192_s23, 4  ;;  %s31_s24 = int_to_ptr.vmem [resolvable:$true] %s30_s24 }
   0x7   :  { %33 = dma.hbm_to_vmem [thread:$0]  %s29_s22, 16, %s31_s24, [#allocation6]  }
   0x8   :  { %185 = dma.done.wait [#allocation3], 64  }
   0x9   :  { %186 = vsyncadd [#allocation3], 4294967232 }
   0xa   :  { %187 = dma.done.wait [#allocation6], 16  }
   0xb   :  { %188 = vsyncadd [#allocation6], 4294967280  ;;  %v46_v0 = vld [vmem:[#allocation2] sm:$0xf]  ;;  %v106_v1 = vld [vmem:[#allocation5] ss:$0 sm:$0xff] }
   0xc   :  { %v107_v2 = vld [vmem:[%s237_s3] ss:$0 sm:$0xff]  ;;  %v53_v3 = vsub.f32 %v46_v0, %v106_v1  ;;  %s193_s3 = smov [#allocation7]   ;;  %s91_s30 = sshll.u32 %s238_s4, 4  ;;  %s92_s30 = int_to_ptr.hbm [resolvable:$true] %s91_s30 }
   0xd   :  { %v108_v13 = vld [vmem:[%s236_s2] ss:$0 sm:$0xff]  ;;  %s89_s27 = sshll.u32 %s193_s3, 4  ;;  %s90_s27 = int_to_ptr.vmem [resolvable:$true] %s89_s27 }
   0xe   :  { %v57_v4 = vmul.f32 %v107_v2, %v53_v3  ;;  %v80_v17 = vsub.f32 %v108_v13, %v46_v0 }
  0x10   :  { %v102_v5 = vmul.f32 -1.442695, %v57_v4 }
  0x12   :  { %109 = vpow2.f32 %v102_v5 }
  0x18   :  { %v110_v6 = vpop.eup %109 }
  0x19   :  { %v61_v7 = vadd.f32 1.0, %v110_v6 }
  0x1b   :  { %111 = vrcp.f32 %v61_v7  ;;  %v73_v10 = vand.u32 2147483648, %v61_v7  ;;  %vm67_vm0 = vweird.f32 %v61_v7  ;;  %v71_v12 = vand.u32 2147483647, %v61_v7 }
  0x1d   :  { %v74_v15 = vor.u32 1.1754944e-38, %v73_v10  ;;  %vm72_vm3 = vcmp.eq.f32.partialorder %v71_v12, 8.507059e+37 }
  0x21   :  { %v112_v8 = vpop.eup %111 }
  0x22   :  { %v63_v9 = vmul.f32 %v112_v8, %v61_v7  ;;  %vm68_vm1 = vweird.f32 %v112_v8 }
  0x23   :  { %vm69_vm2 = vmor %vm67_vm0, %vm68_vm1 }
  0x24   :  { %v64_v11 = vsub.f32 1.0, %v63_v9 }
  0x26   :  { %v65_v14 = vmul.f32 %v112_v8, %v64_v11 }
  0x28   :  { %v66_v16 = vadd.f32 %v112_v8, %v65_v14 }
  0x2a   :  { %v70_v18 = vsel %vm69_vm2, %v112_v8, %v66_v16 }
  0x2b   :  { %v75_v19 = vsel %vm72_vm3, %v74_v15, %v70_v18 }
  0x2c   :  { %v81_v20 = vmul.f32 %v80_v17, %v75_v19 }
  0x2e   :  { %v82_v21 = vadd.f32 %v81_v20, %v46_v0 }
  0x30   :  { %83 = vst [vmem:[#allocation7] sm:$0xf] %v82_v21 }
  0x31   :  { %94 = dma.vmem_to_hbm [thread:$0]  %s90_s27, 64, %s92_s30, [#allocation4]  }
  0x32   :  { %189 = dma.done.wait [#allocation4], 64  }
  0x33   :  { %190 = vsyncadd [#allocation4], 4294967232 }
  0x34   :  { %99 = vsyncpa [#allocation3], 1 }
  0x35   :  { %100 = vsyncpa [#allocation6], 1 }
  0x36   :  { %101 = vsyncpa [#allocation4], 1 }

</bundles_post_ra>
